<compile_context>
chip_gen: v7x
topology: tpu7x:2x2x1
jax: 0.10.0
libtpu: 0.0.40
codegen_flags: <defaults>
</compile_context>

<pallas_src>
import functools

import jax
import jax.numpy as jnp
from jax.experimental import pallas as pl
from jax.experimental.pallas import tpu as pltpu

HIDDEN = 256


def _round_up(x, m):
    return ((x + m - 1) // m) * m


def dqn_kernel(x_ref, w1_ref, b1_ref, w2_ref, b2_ref, o_ref):
    # bf16 cast in-kernel (VPU, hidden under the mem-bound pipeline), MXU matmuls
    # with f32 accumulation, f32 bias-add / ReLU.
    x = x_ref[...].astype(jnp.bfloat16)
    h = jnp.dot(x, w1_ref[...], preferred_element_type=jnp.float32)
    h = jnp.maximum(h + b1_ref[...], 0.0)
    out = jnp.dot(h.astype(jnp.bfloat16), w2_ref[...],
                  preferred_element_type=jnp.float32)
    o_ref[...] = (out + b2_ref[...]).astype(o_ref.dtype)


def prepare_params(w1, b1, w2, b2):
    """One-time weight prep (hoisted out of the per-step forward).

    w1: (n_obs, 256), b1: (1, 256) or (256,), w2: (256, n_actions),
    b2: (1, n_actions) or (n_actions,).  Returns bf16 weights / f32 biases
    in the shapes the kernel expects."""
    w1b = jnp.asarray(w1, jnp.bfloat16)
    w2b = jnp.asarray(w2, jnp.bfloat16)
    b1f = jnp.asarray(b1, jnp.float32).reshape(1, HIDDEN)
    b2f = jnp.asarray(b2, jnp.float32).reshape(1, -1)
    return w1b, b1f, w2b, b2f


def dqn_forward(x, w1b, b1f, w2b, b2f, *, block_b=512):
    """x: (B, n_obs) f32; params from prepare_params.
       Returns (B, n_actions) f32."""
    B, n_obs = x.shape
    n_actions = w2b.shape[1]

    # --- batch tiling: minimal padding, >=2 grid steps when possible ---------
    b8 = _round_up(B, 8)
    n_blocks = pl.cdiv(B, block_b)
    if n_blocks < 2 and b8 >= 16:
        n_blocks = 2                       # keep both v7x TensorCores busy
    tb = _round_up(pl.cdiv(B, n_blocks), 8)
    b_pad = n_blocks * tb

    xp = x
    if b_pad != B:                          # at most n_blocks*8 - 1 extra rows
        xp = jnp.zeros((b_pad, n_obs), x.dtype).at[:B, :].set(x)

    grid = (n_blocks,)
    flops = 2 * b_pad * (n_obs * HIDDEN + HIDDEN * n_actions)
    bytes_accessed = (xp.size * xp.dtype.itemsize
                      + w1b.size * 2 + w2b.size * 2
                      + b1f.size * 4 + b2f.size * 4
                      + b_pad * n_actions * 4)

    out = pl.pallas_call(
        dqn_kernel,
        out_shape=jax.ShapeDtypeStruct((b_pad, n_actions), jnp.float32),
        grid_spec=pltpu.PrefetchScalarGridSpec(
            num_scalar_prefetch=0,
            grid=grid,
            in_specs=[
                pl.BlockSpec((tb, n_obs), lambda i: (i, 0)),          # x tile (streams)
                pl.BlockSpec((n_obs, HIDDEN), lambda i: (0, 0)),      # w1 resident
                pl.BlockSpec((1, HIDDEN), lambda i: (0, 0)),          # b1 resident
                pl.BlockSpec((HIDDEN, n_actions), lambda i: (0, 0)),  # w2 resident
                pl.BlockSpec((1, n_actions), lambda i: (0, 0)),       # b2 resident
            ],
            out_specs=pl.BlockSpec((tb, n_actions), lambda i: (i, 0)),
        ),
        compiler_params=pltpu.CompilerParams(
            dimension_semantics=("parallel",),        # shards across TCs on v7x
        ),
        cost_estimate=pl.CostEstimate(
            flops=flops, transcendentals=0, bytes_accessed=bytes_accessed),
    )(xp, w1b, b1f, w2b, b2f)

    return out[:B, :] if b_pad != B else out


def init_params(key, n_observations, n_actions):
    """Deterministic parameter init mirroring the PyTorch module's __init__."""
    k1, k2, k3, k4 = jax.random.split(key, 4)
    # layer1.weight: xavier_uniform_ over (256, n_obs) -> stored transposed.
    bound1 = jnp.sqrt(6.0 / (n_observations + HIDDEN))
    w1 = jax.random.uniform(k1, (n_observations, HIDDEN), jnp.float32,
                            minval=-bound1, maxval=bound1)
    # layer1.bias: PyTorch default uniform(-1/sqrt(fan_in), 1/sqrt(fan_in)).
    bb1 = 1.0 / jnp.sqrt(jnp.float32(n_observations))
    b1 = jax.random.uniform(k2, (1, HIDDEN), jnp.float32, minval=-bb1, maxval=bb1)
    # layer8.weight / bias: PyTorch default init, fan_in = 256.
    bb2 = 1.0 / jnp.sqrt(jnp.float32(HIDDEN))
    w2 = jax.random.uniform(k3, (HIDDEN, n_actions), jnp.float32,
                            minval=-bb2, maxval=bb2)
    b2 = jax.random.uniform(k4, (1, n_actions), jnp.float32, minval=-bb2, maxval=bb2)
    return w1, b1, w2, b2


def _ref_forward(x, w1, b1, w2, b2):
    # Pure-JAX reference with the same bf16-in / f32-accumulate numerics.
    xb, w1b, w2b = (t.astype(jnp.bfloat16) for t in (x, w1, w2))
    h = jnp.maximum(jnp.dot(xb, w1b, preferred_element_type=jnp.float32) + b1, 0.0)
    return jnp.dot(h.astype(jnp.bfloat16), w2b,
                   preferred_element_type=jnp.float32) + b2


if __name__ == "__main__":
    key = jax.random.PRNGKey(0)
    n_observations, n_actions = 32, 8

    kx, kx2, kp = jax.random.split(key, 3)
    w1, b1, w2, b2 = init_params(kp, n_observations, n_actions)
    params = prepare_params(w1, b1, w2, b2)   # one-time weight prep

    fwd = functools.partial(dqn_forward, block_b=512)

    # Small batch (single grid block: 8 rows < 16 so no forced 2-way split).
    x_small = jax.random.normal(kx, (8, n_observations), jnp.float32)
    out_small = fwd(x_small, *params)
    jax.block_until_ready(out_small)
    ref_small = _ref_forward(x_small, w1, b1, w2, b2)
    assert out_small.shape == (8, n_actions)
    assert jnp.allclose(out_small, ref_small, atol=2e-2, rtol=2e-2)

    # Ragged larger batch (exercises 2-block grid + minimal B padding + slicing).
    x_big = jax.random.normal(kx2, (300, n_observations), jnp.float32)
    out_big = fwd(x_big, *params)
    jax.block_until_ready(out_big)
    ref_big = _ref_forward(x_big, w1, b1, w2, b2)
    assert out_big.shape == (300, n_actions)
    assert jnp.allclose(out_big, ref_big, atol=2e-2, rtol=2e-2)

    print("KERNEL_OK")
</pallas_src>

<mosaic_0001>
module attributes {stable_mosaic.version = 11 : i64} {
  func.func @dqn_kernel(%arg0: i32, %arg1: memref<8x32xf32, #tpu.memory_space<vmem>>, %arg2: memref<32x256xbf16, #tpu.memory_space<vmem>>, %arg3: memref<1x256xf32, #tpu.memory_space<vmem>>, %arg4: memref<256x8xbf16, #tpu.memory_space<vmem>>, %arg5: memref<1x8xf32, #tpu.memory_space<vmem>>, %arg6: memref<8x8xf32, #tpu.memory_space<vmem>>) attributes {dimension_semantics = [#tpu.dimension_semantics<parallel>], iteration_bounds = array<i64: 1>, scalar_prefetch = 0 : i64, scratch_operands = 0 : i64, tpu.core_type = #tpu.core_type<tc>, window_params = [{transform_indices = @transform_0, window_bounds = array<i64: 8, 32>}, {pipeline_mode = #tpu.pipeline_mode<synchronous>, transform_indices = @transform_1, window_bounds = array<i64: 32, 256>}, {pipeline_mode = #tpu.pipeline_mode<synchronous>, transform_indices = @transform_2, window_bounds = array<i64: 1, 256>}, {pipeline_mode = #tpu.pipeline_mode<synchronous>, transform_indices = @transform_3, window_bounds = array<i64: 256, 8>}, {pipeline_mode = #tpu.pipeline_mode<synchronous>, transform_indices = @transform_4, window_bounds = array<i64: 1, 8>}, {transform_indices = @transform_5, window_bounds = array<i64: 8, 8>}]} {
    %c0 = arith.constant 0 : index
    %c0_0 = arith.constant 0 : index
    %0 = vector.load %arg1[%c0, %c0_0] : memref<8x32xf32, #tpu.memory_space<vmem>>, vector<8x32xf32>
    %1 = arith.truncf %0 : vector<8x32xf32> to vector<8x32xbf16>
    %c0_1 = arith.constant 0 : index
    %c0_2 = arith.constant 0 : index
    %2 = vector.load %arg2[%c0_1, %c0_2] : memref<32x256xbf16, #tpu.memory_space<vmem>>, vector<32x256xbf16>
    %cst = arith.constant dense<0.000000e+00> : vector<8x256xf32>
    %3 = tpu.matmul %1, %2, %cst {dimension_numbers = #tpu.dot_dimension_numbers<[1], [0], [0], [1], [0, 0, 1, 1], [], []>} : vector<8x32xbf16>, vector<32x256xbf16>, vector<8x256xf32> -> vector<8x256xf32>
    %c0_3 = arith.constant 0 : index
    %c0_4 = arith.constant 0 : index
    %4 = vector.load %arg3[%c0_3, %c0_4] : memref<1x256xf32, #tpu.memory_space<vmem>>, vector<1x256xf32>
    %5 = vector.broadcast %4 : vector<1x256xf32> to vector<8x256xf32>
    %6 = arith.addf %3, %5 : vector<8x256xf32>
    %cst_5 = arith.constant 0.000000e+00 : f32
    %7 = vector.broadcast %cst_5 : f32 to vector<8x256xf32>
    %8 = arith.maximumf %6, %7 : vector<8x256xf32>
    %9 = arith.truncf %8 : vector<8x256xf32> to vector<8x256xbf16>
    %c0_6 = arith.constant 0 : index
    %c0_7 = arith.constant 0 : index
    %10 = vector.load %arg4[%c0_6, %c0_7] : memref<256x8xbf16, #tpu.memory_space<vmem>>, vector<256x8xbf16>
    %cst_8 = arith.constant dense<0.000000e+00> : vector<8x8xf32>
    %11 = tpu.matmul %9, %10, %cst_8 {dimension_numbers = #tpu.dot_dimension_numbers<[1], [0], [0], [1], [0, 0, 1, 1], [], []>} : vector<8x256xbf16>, vector<256x8xbf16>, vector<8x8xf32> -> vector<8x8xf32>
    %c0_9 = arith.constant 0 : index
    %c0_10 = arith.constant 0 : index
    %12 = vector.load %arg5[%c0_9, %c0_10] : memref<1x8xf32, #tpu.memory_space<vmem>>, vector<1x8xf32>
    %13 = vector.broadcast %12 : vector<1x8xf32> to vector<8x8xf32>
    %14 = arith.addf %11, %13 : vector<8x8xf32>
    %c0_11 = arith.constant 0 : index
    %c0_12 = arith.constant 0 : index
    %15 = vector.load %arg6[%c0_11, %c0_12] : memref<8x8xf32, #tpu.memory_space<vmem>>, vector<8x8xf32>
    tpu.vector_store %arg6[%c0_11, %c0_12], %14 {strides = array<i32>} : memref<8x8xf32, #tpu.memory_space<vmem>>, vector<8x8xf32>,
    return
  }
  func.func @transform_0(%arg0: i32) -> (i32, i32) {
    %c0_i32 = arith.constant 0 : i32
    %c0_i32_0 = arith.constant 0 : i32
    return %arg0, %c0_i32 : i32, i32
  }
  func.func @transform_1(%arg0: i32) -> (i32, i32) {
    %c0_i32 = arith.constant 0 : i32
    %c0_i32_0 = arith.constant 0 : i32
    %c0_i32_1 = arith.constant 0 : i32
    return %c0_i32, %c0_i32_0 : i32, i32
  }
  func.func @transform_2(%arg0: i32) -> (i32, i32) {
    %c0_i32 = arith.constant 0 : i32
    %c0_i32_0 = arith.constant 0 : i32
    %c0_i32_1 = arith.constant 0 : i32
    return %c0_i32, %c0_i32_0 : i32, i32
  }
  func.func @transform_3(%arg0: i32) -> (i32, i32) {
    %c0_i32 = arith.constant 0 : i32
    %c0_i32_0 = arith.constant 0 : i32
    %c0_i32_1 = arith.constant 0 : i32
    return %c0_i32, %c0_i32_0 : i32, i32
  }
  func.func @transform_4(%arg0: i32) -> (i32, i32) {
    %c0_i32 = arith.constant 0 : i32
    %c0_i32_0 = arith.constant 0 : i32
    %c0_i32_1 = arith.constant 0 : i32
    return %c0_i32, %c0_i32_0 : i32, i32
  }
  func.func @transform_5(%arg0: i32) -> (i32, i32) {
    %c0_i32 = arith.constant 0 : i32
    %c0_i32_0 = arith.constant 0 : i32
    return %arg0, %c0_i32 : i32, i32
  }
}

</mosaic_0001>

<bundles_post_ra>
// kernel: tpu_custom_call.1
= control target key start
LH: loop header
LB: loop body
LE: loop exit
PB: predicated region body
PF: predicated region fallthrough
CT: control target
= control target key end

     0   :  { %v392_v2 = vmov 0   ;;  %vm60_vm0 = vcmask 261120   ;;  %s505_s0 = inlined_call_operand.vmem [shape: f32[8,32], index: 0, kind: input, shape index: {}]   ;;  %s506_s1 = inlined_call_operand.vmem [shape: bf16[32,256], index: 1, kind: input, shape index: {}]   ;;  %s507_s2 = inlined_call_operand.vmem [shape: f32[1,256], index: 2, kind: input, shape index: {}]   ;;  %s508_s3 = inlined_call_operand.vmem [shape: bf16[256,8], index: 3, kind: input, shape index: {}]   ;;  %s509_s4 = inlined_call_operand.vmem [shape: f32[1,8], index: 4, kind: input, shape index: {}]   ;;  %s510_s5 = inlined_call_operand.hbm [shape: f32[8,8], index: 5, kind: output, shape index: {}]  }
   0x1   :  { %v346_v0 = vld [vmem:[%s506_s1 + $0x4] ss:$8 sps:$4 sm:$0xff]   ;;  %v348_v1 = vld [vmem:[%s506_s1] ss:$8 sps:$4 sm:$0xff]   ;;  %96 = vmatprep.mubr.bf16.mxu0 %v392_v2  ;;  %v349_v3 = vld [vmem:[%s506_s1 + $0x14] ss:$8 sps:$4 sm:$0xff]  }
   0x2   :  { %64 = vmatprep.subr.bf16.mxu0 %v346_v0  ;;  %v351_v4 = vld [vmem:[%s506_s1 + $0x10] ss:$8 sps:$4 sm:$0xff]   ;;  %v22_v5 = vld [vmem:[%s505_s0] sm:$0xff]  ;;  %v354_v8 = vld [vmem:[%s508_s3 + $0x48] sm:$0xff]  }
   0x3   :  { %65 = vmatpush1.bf16.msra.mxu0 %v348_v1  ;;  %v352_v6 = vld [vmem:[%s508_s3 + $0x40] sm:$0xff]   ;;  %v23_v9 = vpack.c.bf16 %v22_v5, %v22_v5  ;;  %v355_v10 = vld [vmem:[%s508_s3 + $0x8] sm:$0xff]   ;;  %v356_v11 = vld [vmem:[%s508_s3 + $0x50] sm:$0xff]  }
   0x4   :  { %66 = vmatprep.subr.bf16.mxu0 %v349_v3  ;;  %v353_v7 = vld [vmem:[%s508_s3] sm:$0xff]   ;;  %322 = vmatprep.subr.bf16.mxu1 %v352_v6  ;;  %v357_v12 = vld [vmem:[%s508_s3 + $0x10] sm:$0xff]   ;;  %v358_v13 = vld [vmem:[%s508_s3 + $0x58] sm:$0xff]  }
   0x5   :  { %323 = vmatpush3.bf16.msra.mxu1 %v353_v7  ;;  %v359_v14 = vld [vmem:[%s508_s3 + $0x18] sm:$0xff]   ;;  %v360_v15 = vld [vmem:[%s508_s3 + $0x60] sm:$0xff]  }
   0x6   :  { %324 = vmatprep.subr.bf16.mxu1 %v354_v8  ;;  %v361_v16 = vld [vmem:[%s508_s3 + $0x20] sm:$0xff]  }
   0x7   :  { %67 = vmatpush1.bf16.msra.mxu0 %v351_v4 }
   0x9   :  { %325 = vmatpush3.bf16.msra.mxu1 %v355_v10 }
   0xa   :  { %304 = vmatmul.mubr.msk.bf16.vlgmr.msra.gmra.mrb[0].mxu0 %vm60_vm0, %v23_v9  ;;  %326 = vmatprep.subr.bf16.mxu1 %v356_v11 }
   0xd   :  { %327 = vmatpush3.bf16.msra.mxu1 %v357_v12 }
   0xe   :  { %328 = vmatprep.subr.bf16.mxu1 %v358_v13 }
  0x11   :  { %329 = vmatpush3.bf16.msra.mxu1 %v359_v14 }
  0x12   :  { %10 = vsyncpa [#allocation3], 0  ;;  %330 = vmatprep.subr.bf16.mxu1 %v360_v15  ;;  %v362_v17 = vld [vmem:[%s508_s3 + $0x68] sm:$0xff]   ;;  %v364_v19 = vld [vmem:[%s508_s3 + $0x70] sm:$0xff]   ;;  %v30_v23 = vlaneseq  ;;  %vm284_vm1 = vcmask 64512  }
  0x13   :  { %v363_v18 = vld [vmem:[%s508_s3 + $0x28] sm:$0xff]   ;;  %v365_v20 = vld [vmem:[%s508_s3 + $0x30] sm:$0xff]   ;;  %v366_v21 = vld [vmem:[%s508_s3 + $0x78] sm:$0xff]  }
  0x14   :  { %v367_v22 = vld [vmem:[%s508_s3 + $0x38] sm:$0xff]   ;;  %v31_v24 = vshrl.u32 %v30_v23, 7  ;;  %v28_v26 = vld [vmem:[%s507_s2] sm:$0x3]  ;;  %s393_s2 = smov [#allocation2]  }
  0x15   :  { %331 = vmatpush3.bf16.msra.mxu1 %v361_v16  ;;  %v305_v41 = vld [vmem:[%s509_s4] ss:$0 sm:$0xff]  ;;  %s292_s0 = sshll.u32 %s393_s2, 4  ;;  %s293_s0 = int_to_ptr.vmem [resolvable:$true] %s292_s0 }
  0x16   :  { %332 = vmatprep.subr.bf16.mxu1 %v362_v17  ;;  %v32_v25 = vsub.s32 0, %v31_v24  ;;  %v36_v27 = vsub.s32 1, %v31_v24  ;;  %s368_s10 = scalar_lea.vmem %s293_s0, 128  ;;  %p373_p1 = scmp.lt.s32.totalorder %s293_s0, %s293_s0 }
  0x17   :  { %p369_p0 = scmp.ne.s32.totalorder %s293_s0, %s368_s10  ;;  %p374_p2 = scmp.lt.s32.totalorder %s368_s10, %s368_s10 }
  0x18   :  { %v33_v28 = vrot.slane %v28_v26, %v32_v25  ;;  %v37_v29 = vrot.slane %v28_v26, %v36_v27 }
  0x19   :  { %333 = vmatpush3.bf16.msra.mxu1 %v363_v18  ;;  %p375_p3 = por %p374_p2, %p373_p1 }
  0x1a   :  { %334 = vmatprep.subr.bf16.mxu1 %v364_v19 }
  0x1b   :  { %p376_p4 = pnand %p375_p3, %p369_p0 }
  0x1d   :  { %335 = vmatpush3.bf16.msra.mxu1 %v365_v20 }
  0x1e   :  { %336 = vmatprep.subr.bf16.mxu1 %v366_v21 }
  0x21   :  { %337 = vmatpush3.bf16.msra.mxu1 %v367_v22 }
  0xdd   :  { %v98_v30 = vpop.f32.mrb[0].mxu0 }
  0xde   :  { %v99_v31 = vadd.f32 %v98_v30, %v33_v28  ;;  %v100_v32 = vpop.f32.mrb[1].mxu0 }
  0xdf   :  { %v101_v33 = vadd.f32 %v100_v32, %v37_v29  ;;  %v102_v34 = vpop.f32.mrb[2].mxu0 }
  0xe0   :  { %v105_v35 = vmax.f32 %v99_v31, 0.0  ;;  %v103_v36 = vpop.f32.mrb[3].mxu0 }
  0xe1   :  { %v106_v37 = vmax.f32 %v101_v33, 0.0 }
  0xe2   :  { %v107_v39 = vpack.c.bf16 %v105_v35, %v105_v35 }
  0xe3   :  { %v108_v38 = vpack.c.bf16 %v106_v37, %v106_v37 }
  0xe5   :  { %276 = vmatprep.mubr.bf16.mxu1 %v108_v38 }
  0xe6   :  { %277 = vmatmul.mubr.bf16.vlgmr.msra.gmra.mrb[0].mxu1 %v107_v39 }
 0x1b9   :  { %v338_v40 = vpop.f32.mrb[0].mxu1 }
 0x1ba   :  { %v339_v42 = vpop.f32.mrb[1].mxu1 }
 0x1bb   :  { %v340_v43 = vadd.f32 %v339_v42, %v338_v40  ;;  %v341_v44 = vpop.f32.mrb[2].mxu1 }
 0x1bc   :  { %v342_v45 = vpop.f32.mrb[3].mxu1 }
 0x1bd   :  { %v279_v46 = vadd.f32 %v340_v43, %v305_v41 }
 0x1bf   :  { %285 = vst.msk [vmem:[#allocation2] sm:$0xff] %vm284_vm1, %v279_v46 }
 0x1c0   :  { %379 = shalt.err (!%p376_p4)
}
 0x1c1   :  { %s380_s4 = scalar_lea.hbm %s510_s5, 128 }
 0x1c2   :  { %p381_p5 = scmp.ne.s32.totalorder %s510_s5, %s380_s4  ;;  %p384_p6 = scmp.lt.u32.totalorder %s380_s4, %s510_s5 }
 0x1c4   :  { %p386_p7 = pnand %p384_p6, %p381_p5 }
 0x1c6   :  { %389 = shalt.err (!%p386_p7)
}
 0x1c7   :  { %295 = dma.vmem_to_hbm [thread:$0]  %s293_s0, 128, %s510_s5, [#allocation3]  }
 0x1c8   :  { %390 = dma.done.wait [#allocation3], 128  }
 0x1c9   :  { %391 = vsyncadd [#allocation3], 4294967168 }
 0x1ca   :  { %299 = vsyncpa [#allocation3], 1 }

</bundles_post_ra>
